<compile_context>
chip_gen: v5e
topology: v5e:2x2
jax: 0.10.0
libtpu: 0.0.40
codegen_flags: <defaults>
</compile_context>

<pallas_src>
import jax
import jax.numpy as jnp
from jax.experimental import pallas as pl
from jax.experimental.pallas import tpu as pltpu

# Module hyper-parameters (num_heads / head_dim are module-level globals in the
# reference code; chosen here).
NUM_HEADS = 4
HEAD_DIM = 8
TOTAL_DIM = NUM_HEADS * HEAD_DIM          # key_dim == value_dim == total_dim
EMBED_DIM = 32
CONV_CH = 32                              # channels of the custom extractor conv
KPATCH = 3 * 3 * 3                        # 3x3 conv, 3 input channels
KPAD = 32                                 # patch dim padded 27 -> 32
OUT_DIM = 2 * TOTAL_DIM                   # keys || values (64)
OUT_PAD = 128                             # lane-dense output width (zero-padded)

VMEM_TILE_BUDGET = 20 * 1024 * 1024       # budget used for NB / ROWS_T sizing
VMEM_LIMIT_BYTES = 32 * 1024 * 1024       # explicit scoped-VMEM limit


def _lora_pool_kernel(pdiff_ref, wconv_ref, bconv_ref, wtail_ref, btail_ref,
                      out_ref, acc_ref):
    # pdiff_ref : (1, NB, ROWS_T, K)  packed patch diffs (pack patches / row)
    # wconv_ref : (K, K)              block-diagonal conv weight
    # bconv_ref : (1, K)              conv bias tiled per lane-group
    # wtail_ref : (K, OUT_PAD)        folded fc->proj->[key|val] weight (x 1/P)
    # btail_ref : (1, OUT_PAD)
    # out_ref   : (1, NB, OUT_PAD)
    # acc_ref   : (NB, OUT_PAD) f32 accumulator over the P-tile ("arbitrary") axis
    t = pl.program_id(1)

    @pl.when(t == 0)
    def _():
        acc_ref[...] = jnp.zeros_like(acc_ref)

    _, nb, rows_t, k = pdiff_ref.shape
    x = pdiff_ref[...].reshape(nb * rows_t, k)
    # Conv 3x3 (pad=1) as one big lane-dense matmul + bias + ReLU (f32 accum).
    conv = jnp.dot(x, wconv_ref[...], preferred_element_type=jnp.float32)
    conv = jnp.maximum(conv + bconv_ref[...], 0.0)            # (NB*ROWS_T, K)
    # Partial global-avg-pool: sum over this tile's rows per image (the 1/P
    # scale lives in wtail; the pack lane-groups are reduced by the tail matmul).
    pooled = conv.reshape(nb, rows_t, k).sum(axis=1)          # (NB, K)
    acc_ref[...] += jnp.dot(pooled, wtail_ref[...],
                            preferred_element_type=jnp.float32)

    @pl.when(t == pl.num_programs(1) - 1)
    def _():
        out_ref[...] = (acc_ref[...] + btail_ref[...]).reshape(1, nb, -1)


def _extract_patches(x):
    """im2col for a 3x3 / pad=1 conv.  x: (B, H, W, 3) -> (B, H*W, 27)."""
    B, H, W, C = x.shape
    xp = jnp.pad(x, ((0, 0), (1, 1), (1, 1), (0, 0)))
    taps = [xp[:, dh:dh + H, dw:dw + W, :] for dh in range(3) for dw in range(3)]
    patches = jnp.stack(taps, axis=3)                         # (B, H, W, 9, 3)
    return patches.reshape(B, H * W, 9 * C)


def _tc_per_chip():
    """1 TensorCore (v5e/v6e) vs 2 (v4/v5p/v7x megacore) — perf preference only."""
    try:
        kind = jax.devices()[0].device_kind.lower()
    except Exception:
        return 1
    return 2 if any(tag in kind for tag in ("v7", "v5p", "v4")) else 1


def _pick_pack(P):
    for pack in (8, 4, 2, 1):
        if P % pack == 0:
            return pack
    return 1


def _vmem_per_step(nb, rows_t, k, in_bytes):
    blk_in = nb * rows_t * k * in_bytes * 2           # double-buffered patch block
    conv_tmp = nb * rows_t * k * 4 * 2                # f32 conv + relu temporaries
    weights = (k * k * in_bytes + k * OUT_PAD * 4 + (k + OUT_PAD) * 4) * 2
    acc_out = nb * OUT_PAD * 4 * 3
    return blk_in + conv_tmp + weights + acc_out


def _pick_tiling(B, rows, k, in_bytes):
    """Pick NB (batch block) and ROWS_T (rows per P-tile) against the VMEM budget."""
    tc = _tc_per_chip()
    nb_divs = [n for n in (8, 4, 2, 1) if B % n == 0]
    if tc >= 2:
        # Keep both TensorCores fed: prefer an even (>=2) number of batch blocks.
        pref = [n for n in nb_divs if (B // n) >= 2 and (B // n) % 2 == 0]
        pref += [n for n in nb_divs if (B // n) >= 2 and n not in pref]
        nb_order = pref + [n for n in nb_divs if n not in pref]
    else:
        nb_order = nb_divs        # single TC: the grid is a serial loop; maximize NB

    def shrink_rows(nb):
        rows_t = rows
        while (_vmem_per_step(nb, rows_t, k, in_bytes) > VMEM_TILE_BUDGET
               and rows_t % 16 == 0):
            rows_t //= 2          # keep rows_t a multiple of 8 and a divisor of rows
        return rows_t

    for nb in nb_order:
        rows_t = shrink_rows(nb)
        if _vmem_per_step(nb, rows_t, k, in_bytes) <= VMEM_TILE_BUDGET:
            return nb, rows_t
    nb = nb_order[-1]
    return nb, shrink_rows(nb)


def _fold_tail(params, P):
    """Fold fc @ proj @ [key|val] (no nonlinearity between them) and the 1/P
    global-avg-pool scale into a single (CONV_CH, OUT_DIM) weight + bias."""
    w_kv = jnp.concatenate([params["w_key"], params["w_val"]], axis=1)   # (32, 64)
    b_kv = jnp.concatenate([params["b_key"], params["b_val"]], axis=1)   # (1, 64)
    w_pk = params["w_proj"] @ w_kv                                       # (32, 64)
    w_tail = (params["w_fc"] @ w_pk) / jnp.float32(P)                    # 1/P folded
    b_tail = params["b_fc"] @ w_pk + params["b_proj"] @ w_kv + b_kv      # (1, 64)
    return w_tail, b_tail


def lora_pool_forward(denoised_image, denoised_with_lora, params,
                      conv_dtype=jnp.float32):
    """Returns (keys, values), each (B, NUM_HEADS, HEAD_DIM).

    conv_dtype=jnp.bfloat16 halves the dominant patch-tensor HBM/DMA bytes and
    runs the MXU at its native bf16 rate; accumulation stays f32.  The f32
    default keeps the tight reference tolerance.
    """
    B, H, W, _ = denoised_image.shape
    P = H * W
    pack = _pick_pack(P)
    K = pack * KPAD
    rows = P // pack
    in_bytes = jnp.dtype(conv_dtype).itemsize
    NB, ROWS_T = _pick_tiling(B, rows, K, in_bytes)
    G = B // NB
    PT = rows // ROWS_T

    # diff BEFORE im2col (im2col is linear) -> single patch tensor in HBM.
    diff = denoised_with_lora - denoised_image
    pdiff = _extract_patches(diff)                                    # (B, P, 27)
    pdiff = jnp.pad(pdiff, ((0, 0), (0, 0), (0, KPAD - KPATCH)))      # (B, P, 32)
    # Pack `pack` patches per matmul row (contiguous reshape, lane-dense K).
    pdiff = pdiff.reshape(G, NB, rows, K).astype(conv_dtype)

    # Block-diagonal conv weight: each lane-group applies the same 27->32 conv.
    w_conv_pad = jnp.zeros((KPAD, CONV_CH), jnp.float32).at[:KPATCH].set(
        params["w_conv"])
    w_conv_blk = jnp.kron(jnp.eye(pack, dtype=jnp.float32),
                          w_conv_pad).astype(conv_dtype)              # (K, K)
    b_conv_t = jnp.tile(params["b_conv"], (1, pack)).astype(jnp.float32)  # (1, K)

    # Folded tail, stacked per lane-group, columns zero-padded 64 -> 128.
    w_tail, b_tail = _fold_tail(params, P)
    w_tail = jnp.tile(w_tail, (pack, 1))                              # (K, 64)
    w_tail = jnp.pad(w_tail, ((0, 0), (0, OUT_PAD - OUT_DIM)))        # (K, 128)
    b_tail = jnp.pad(b_tail, ((0, 0), (0, OUT_PAD - OUT_DIM)))        # (1, 128)

    def full(shape):
        return pl.BlockSpec(shape, lambda g, t: tuple(0 for _ in shape))

    grid_spec = pltpu.PrefetchScalarGridSpec(
        num_scalar_prefetch=0,
        grid=(G, PT),
        in_specs=[
            pl.BlockSpec((1, NB, ROWS_T, K), lambda g, t: (g, 0, t, 0)),
            full((K, K)), full((1, K)),                               # conv w/b
            full((K, OUT_PAD)), full((1, OUT_PAD)),                   # folded tail w/b
        ],
        out_specs=pl.BlockSpec((1, NB, OUT_PAD), lambda g, t: (g, 0, 0)),
        scratch_shapes=[pltpu.VMEM((NB, OUT_PAD), jnp.float32)],
    )

    cost = pl.CostEstimate(
        flops=int(2 * B * P * KPAD * CONV_CH + 2 * B * PT * K * OUT_PAD),
        transcendentals=0,
        bytes_accessed=int(pdiff.size * in_bytes + K * K * in_bytes
                           + K * OUT_PAD * 4 + G * NB * OUT_PAD * 4),
    )

    out = pl.pallas_call(
        _lora_pool_kernel,
        grid_spec=grid_spec,
        out_shape=jax.ShapeDtypeStruct((G, NB, OUT_PAD), jnp.float32),
        compiler_params=pltpu.CompilerParams(
            dimension_semantics=("parallel", "arbitrary"),
            vmem_limit_bytes=VMEM_LIMIT_BYTES),
        cost_estimate=cost,
    )(pdiff, w_conv_blk, b_conv_t, w_tail, b_tail)

    out = out.reshape(B, OUT_PAD)
    keys = out[:, :TOTAL_DIM].reshape(B, NUM_HEADS, HEAD_DIM)
    vals = out[:, TOTAL_DIM:OUT_DIM].reshape(B, NUM_HEADS, HEAD_DIM)
    return keys, vals


def init_params(key):
    """Deterministic PyTorch-style (uniform ±1/sqrt(fan_in)) initialization."""
    ks = iter(jax.random.split(key, 16))

    def lin(fan_in, fan_out):
        lim = 1.0 / jnp.sqrt(jnp.float32(fan_in))
        w = jax.random.uniform(next(ks), (fan_in, fan_out), jnp.float32, -lim, lim)
        b = jax.random.uniform(next(ks), (1, fan_out), jnp.float32, -lim, lim)
        return w, b

    p = {}
    p["w_conv"], p["b_conv"] = lin(KPATCH, CONV_CH)
    p["w_fc"], p["b_fc"] = lin(CONV_CH, EMBED_DIM)
    p["w_proj"], p["b_proj"] = lin(EMBED_DIM, EMBED_DIM)
    p["w_key"], p["b_key"] = lin(EMBED_DIM, TOTAL_DIM)
    p["w_val"], p["b_val"] = lin(EMBED_DIM, TOTAL_DIM)
    return p


def _reference_forward(denoised_image, denoised_with_lora, params):
    """Pure-JAX reference (unfolded pipeline) for correctness checking."""
    B = denoised_image.shape[0]
    diff = _extract_patches(denoised_with_lora - denoised_image)          # (B,P,27)
    conv = jnp.maximum(diff @ params["w_conv"] + params["b_conv"], 0.0)   # (B,P,C)
    pooled = jnp.mean(conv, axis=1)                                       # (B,C)
    feat = pooled @ params["w_fc"] + params["b_fc"]
    proj = feat @ params["w_proj"] + params["b_proj"]
    keys = (proj @ params["w_key"] + params["b_key"]).reshape(B, NUM_HEADS, HEAD_DIM)
    vals = (proj @ params["w_val"] + params["b_val"]).reshape(B, NUM_HEADS, HEAD_DIM)
    return keys, vals


if __name__ == "__main__":
    B, H, W = 2, 16, 16
    key = jax.random.PRNGKey(0)
    k_img, k_lora, k_par = jax.random.split(key, 3)

    denoised_image = jax.random.normal(k_img, (B, H, W, 3), jnp.float32)
    denoised_with_lora = jax.random.normal(k_lora, (B, H, W, 3), jnp.float32)
    params = init_params(k_par)

    ref_keys, ref_vals = _reference_forward(denoised_image, denoised_with_lora, params)

    # f32 patch path: exact (up to fold reassociation).
    keys, vals = lora_pool_forward(denoised_image, denoised_with_lora, params)
    keys, vals = jax.block_until_ready((keys, vals))
    assert keys.shape == (B, NUM_HEADS, HEAD_DIM)
    assert vals.shape == (B, NUM_HEADS, HEAD_DIM)
    assert jnp.allclose(keys, ref_keys, rtol=1e-4, atol=1e-4)
    assert jnp.allclose(vals, ref_vals, rtol=1e-4, atol=1e-4)

    # bf16 patch path (half DMA bytes, native MXU rate); loose tolerance.
    keys_bf, vals_bf = lora_pool_forward(denoised_image, denoised_with_lora, params,
                                         conv_dtype=jnp.bfloat16)
    keys_bf, vals_bf = jax.block_until_ready((keys_bf, vals_bf))
    assert jnp.allclose(keys_bf, ref_keys, rtol=5e-2, atol=5e-2)
    assert jnp.allclose(vals_bf, ref_vals, rtol=5e-2, atol=5e-2)

    print("KERNEL_OK")
</pallas_src>

<mosaic_0001>
module attributes {stable_mosaic.version = 11 : i64} {
  func.func @_lora_pool_kernel(%arg0: i32, %arg1: i32, %arg2: memref<1x2x32x256xf32, #tpu.memory_space<vmem>>, %arg3: memref<256x256xf32, #tpu.memory_space<vmem>>, %arg4: memref<1x256xf32, #tpu.memory_space<vmem>>, %arg5: memref<256x128xf32, #tpu.memory_space<vmem>>, %arg6: memref<1x128xf32, #tpu.memory_space<vmem>>, %arg7: memref<1x2x128xf32, #tpu.memory_space<vmem>>, %arg8: memref<2x128xf32, #tpu.memory_space<vmem>>) attributes {dimension_semantics = [#tpu.dimension_semantics<parallel>, #tpu.dimension_semantics<arbitrary>], iteration_bounds = array<i64: 1, 1>, scalar_prefetch = 0 : i64, scratch_operands = 1 : i64, tpu.core_type = #tpu.core_type<tc>, window_params = [{transform_indices = @transform_0, window_bounds = array<i64: 1, 2, 32, 256>}, {pipeline_mode = #tpu.pipeline_mode<synchronous>, transform_indices = @transform_1, window_bounds = array<i64: 256, 256>}, {pipeline_mode = #tpu.pipeline_mode<synchronous>, transform_indices = @transform_2, window_bounds = array<i64: 1, 256>}, {pipeline_mode = #tpu.pipeline_mode<synchronous>, transform_indices = @transform_3, window_bounds = array<i64: 256, 128>}, {pipeline_mode = #tpu.pipeline_mode<synchronous>, transform_indices = @transform_4, window_bounds = array<i64: 1, 128>}, {transform_indices = @transform_5, window_bounds = array<i64: 1, 2, 128>}]} {
    %c0_i32 = arith.constant 0 : i32
    %0 = arith.cmpi eq, %arg1, %c0_i32 : i32
    %1 = arith.extui %0 : i1 to i32
    %c0_i32_0 = arith.constant 0 : i32
    %2 = arith.cmpi ne, %1, %c0_i32_0 : i32
    scf.if %2 {
      %cst_19 = arith.constant 0.000000e+00 : f32
      %22 = vector.broadcast %cst_19 : f32 to vector<2x128xf32>
      %c0_20 = arith.constant 0 : index
      %c0_21 = arith.constant 0 : index
      %23 = vector.load %arg8[%c0_20, %c0_21] : memref<2x128xf32, #tpu.memory_space<vmem>>, vector<2x128xf32>
      tpu.vector_store %arg8[%c0_20, %c0_21], %22 {strides = array<i32>} : memref<2x128xf32, #tpu.memory_space<vmem>>, vector<2x128xf32>,
    } else {
    }
    %c0 = arith.constant 0 : index
    %c0_1 = arith.constant 0 : index
    %c0_2 = arith.constant 0 : index
    %c0_3 = arith.constant 0 : index
    %3 = vector.load %arg2[%c0, %c0_1, %c0_2, %c0_3] : memref<1x2x32x256xf32, #tpu.memory_space<vmem>>, vector<1x2x32x256xf32>
    %4 = vector.shape_cast %3 : vector<1x2x32x256xf32> to vector<64x256xf32>
    %c0_4 = arith.constant 0 : index
    %c0_5 = arith.constant 0 : index
    %5 = vector.load %arg3[%c0_4, %c0_5] : memref<256x256xf32, #tpu.memory_space<vmem>>, vector<256x256xf32>
    %cst = arith.constant dense<0.000000e+00> : vector<64x256xf32>
    %6 = tpu.matmul %4, %5, %cst {dimension_numbers = #tpu.dot_dimension_numbers<[1], [0], [0], [1], [0, 0, 1, 1], [], []>} : vector<64x256xf32>, vector<256x256xf32>, vector<64x256xf32> -> vector<64x256xf32>
    %c0_6 = arith.constant 0 : index
    %c0_7 = arith.constant 0 : index
    %7 = vector.load %arg4[%c0_6, %c0_7] : memref<1x256xf32, #tpu.memory_space<vmem>>, vector<1x256xf32>
    %8 = vector.broadcast %7 : vector<1x256xf32> to vector<64x256xf32>
    %9 = arith.addf %6, %8 : vector<64x256xf32>
    %cst_8 = arith.constant 0.000000e+00 : f32
    %10 = vector.broadcast %cst_8 : f32 to vector<64x256xf32>
    %11 = arith.maximumf %9, %10 : vector<64x256xf32>
    %12 = vector.shape_cast %11 : vector<64x256xf32> to vector<2x32x256xf32>
    %cst_9 = arith.constant dense<0.000000e+00> : vector<2x256xf32>
    %13 = vector.multi_reduction <add>, %12, %cst_9 [1] : vector<2x32x256xf32> to vector<2x256xf32>
    %c0_10 = arith.constant 0 : index
    %c0_11 = arith.constant 0 : index
    %14 = vector.load %arg8[%c0_10, %c0_11] : memref<2x128xf32, #tpu.memory_space<vmem>>, vector<2x128xf32>
    %c0_12 = arith.constant 0 : index
    %c0_13 = arith.constant 0 : index
    %15 = vector.load %arg5[%c0_12, %c0_13] : memref<256x128xf32, #tpu.memory_space<vmem>>, vector<256x128xf32>
    %cst_14 = arith.constant dense<0.000000e+00> : vector<2x128xf32>
    %16 = tpu.matmul %13, %15, %cst_14 {dimension_numbers = #tpu.dot_dimension_numbers<[1], [0], [0], [1], [0, 0, 1, 1], [], []>} : vector<2x256xf32>, vector<256x128xf32>, vector<2x128xf32> -> vector<2x128xf32>
    %17 = arith.addf %14, %16 : vector<2x128xf32>
    %c0_15 = arith.constant 0 : index
    %c0_16 = arith.constant 0 : index
    %18 = vector.load %arg8[%c0_15, %c0_16] : memref<2x128xf32, #tpu.memory_space<vmem>>, vector<2x128xf32>
    tpu.vector_store %arg8[%c0_15, %c0_16], %17 {strides = array<i32>} : memref<2x128xf32, #tpu.memory_space<vmem>>, vector<2x128xf32>,
    %c0_i32_17 = arith.constant 0 : i32
    %19 = arith.cmpi eq, %arg1, %c0_i32_17 : i32
    %20 = arith.extui %19 : i1 to i32
    %c0_i32_18 = arith.constant 0 : i32
    %21 = arith.cmpi ne, %20, %c0_i32_18 : i32
    scf.if %21 {
      %c0_19 = arith.constant 0 : index
      %c0_20 = arith.constant 0 : index
      %22 = vector.load %arg8[%c0_19, %c0_20] : memref<2x128xf32, #tpu.memory_space<vmem>>, vector<2x128xf32>
      %c0_21 = arith.constant 0 : index
      %c0_22 = arith.constant 0 : index
      %23 = vector.load %arg6[%c0_21, %c0_22] : memref<1x128xf32, #tpu.memory_space<vmem>>, vector<1x128xf32>
      %24 = vector.broadcast %23 : vector<1x128xf32> to vector<2x128xf32>
      %25 = arith.addf %22, %24 : vector<2x128xf32>
      %26 = vector.shape_cast %25 : vector<2x128xf32> to vector<1x2x128xf32>
      %c0_23 = arith.constant 0 : index
      %c0_24 = arith.constant 0 : index
      %c0_25 = arith.constant 0 : index
      %27 = vector.load %arg7[%c0_23, %c0_24, %c0_25] : memref<1x2x128xf32, #tpu.memory_space<vmem>>, vector<1x2x128xf32>
      tpu.vector_store %arg7[%c0_23, %c0_24, %c0_25], %26 {strides = array<i32>} : memref<1x2x128xf32, #tpu.memory_space<vmem>>, vector<1x2x128xf32>,
    } else {
    }
    return
  }
  func.func @transform_0(%arg0: i32, %arg1: i32) -> (i32, i32, i32, i32) {
    %c0_i32 = arith.constant 0 : i32
    %c0_i32_0 = arith.constant 0 : i32
    %c0_i32_1 = arith.constant 0 : i32
    return %arg0, %c0_i32, %arg1, %c0_i32_0 : i32, i32, i32, i32
  }
  func.func @transform_1(%arg0: i32, %arg1: i32) -> (i32, i32) {
    %c0_i32 = arith.constant 0 : i32
    %c0_i32_0 = arith.constant 0 : i32
    %c0_i32_1 = arith.constant 0 : i32
    return %c0_i32, %c0_i32_0 : i32, i32
  }
  func.func @transform_2(%arg0: i32, %arg1: i32) -> (i32, i32) {
    %c0_i32 = arith.constant 0 : i32
    %c0_i32_0 = arith.constant 0 : i32
    %c0_i32_1 = arith.constant 0 : i32
    return %c0_i32, %c0_i32_0 : i32, i32
  }
  func.func @transform_3(%arg0: i32, %arg1: i32) -> (i32, i32) {
    %c0_i32 = arith.constant 0 : i32
    %c0_i32_0 = arith.constant 0 : i32
    %c0_i32_1 = arith.constant 0 : i32
    return %c0_i32, %c0_i32_0 : i32, i32
  }
  func.func @transform_4(%arg0: i32, %arg1: i32) -> (i32, i32) {
    %c0_i32 = arith.constant 0 : i32
    %c0_i32_0 = arith.constant 0 : i32
    %c0_i32_1 = arith.constant 0 : i32
    return %c0_i32, %c0_i32_0 : i32, i32
  }
  func.func @transform_5(%arg0: i32, %arg1: i32) -> (i32, i32, i32) {
    %c0_i32 = arith.constant 0 : i32
    %c0_i32_0 = arith.constant 0 : i32
    %c0_i32_1 = arith.constant 0 : i32
    return %arg0, %c0_i32, %c0_i32_0 : i32, i32, i32
  }
}

</mosaic_0001>

<bundles_post_ra>
// kernel: tpu_custom_call.1
= control target key start
LH: loop header
LB: loop body
LE: loop exit
PB: predicated region body
PF: predicated region fallthrough
CT: control target
= control target key end

     0   :  { %10 = vsyncpa [#allocation4], 0  ;;  %s737_s0 = inlined_call_operand.hbm [shape: f32[1,2,32,256], index: 0, kind: input, shape index: {}]   ;;  %s738_s1 = inlined_call_operand.hbm [shape: f32[256,256], index: 1, kind: input, shape index: {}]   ;;  %s739_s2 = inlined_call_operand.hbm [shape: f32[1,256], index: 2, kind: input, shape index: {}]   ;;  %s740_s3 = inlined_call_operand.hbm [shape: f32[256,128], index: 3, kind: input, shape index: {}]   ;;  %s741_s4 = inlined_call_operand.vmem [shape: f32[1,128], index: 4, kind: input, shape index: {}]   ;;  %s742_s5 = inlined_call_operand.hbm [shape: f32[1,2,128], index: 5, kind: output, shape index: {}]  }
   0x1   :  { %11 = vsyncpa [#allocation7], 0 }
   0x2   :  { %12 = vsyncpa [#allocation10], 0 }
   0x3   :  { %13 = vsyncpa [#allocation5], 0  ;;  %s31_s20 = sshll.u32 %s738_s1, 4  ;;  %s641_s21 = smov [#allocation6]   ;;  %s32_s20 = int_to_ptr.hbm [resolvable:$true] %s31_s20 }
   0x4   :  { %s33_s22 = sshll.u32 %s641_s21, 4  ;;  %s18_s25 = sshll.u32 %s737_s0, 4  ;;  %s34_s22 = int_to_ptr.vmem [resolvable:$true] %s33_s22  ;;  %s19_s25 = int_to_ptr.hbm [resolvable:$true] %s18_s25 }
   0x5   :  { %s642_s26 = smov 256   ;;  %s643_s27 = smov 16  }
   0x6   :  { %39 = dma.hbm_to_vmem [thread:$0]  %s32_s20, 8192, %s34_s22, [#allocation7], %s642_s26, %s642_s26, %s643_s27  }
   0x7   :  { %s644_s28 = smov [#allocation3]   ;;  %s45_s7 = sshll.u32 %s739_s2, 4  ;;  %s46_s7 = int_to_ptr.hbm [resolvable:$true] %s45_s7 }
   0x8   :  { %s20_s29 = sshll.u32 %s644_s28, 4  ;;  %s55_s9 = sshll.u32 %s740_s3, 4  ;;  %s21_s29 = int_to_ptr.vmem [resolvable:$true] %s20_s29  ;;  %s56_s9 = int_to_ptr.hbm [resolvable:$true] %s55_s9 }
   0x9   :  { %26 = dma.hbm_to_vmem [thread:$0]  %s19_s25, 2048, %s21_s29, [#allocation4], %s642_s26, %s642_s26, %s643_s27  }
   0xa   :  { %s645_s10 = smov [#allocation8]   ;;  %s646_s0 = smov [#allocation9]  }
   0xb   :  { %s47_s11 = sshll.u32 %s645_s10, 4  ;;  %s57_s12 = sshll.u32 %s646_s0, 4  ;;  %s48_s11 = int_to_ptr.vmem [resolvable:$true] %s47_s11  ;;  %s58_s12 = int_to_ptr.vmem [resolvable:$true] %s57_s12 }
   0xc   :  { %50 = dma.hbm_to_vmem [thread:$0]  %s46_s7, 32, %s48_s11, [#allocation7]  }
   0xd   :  { %s647_s13 = smov 128   ;;  %s648_s14 = smov 8  }
   0xe   :  { %63 = dma.hbm_to_vmem [thread:$0]  %s56_s9, 4096, %s58_s12, [#allocation10], %s647_s13, %s647_s13, %s648_s14  }
   0xf   :  { %633 = dma.done.wait [#allocation4], 2048  }
  0x10   :  { %634 = vsyncadd [#allocation4], 4294965248 }
  0x11   :  { %635 = dma.done.wait [#allocation7], 8224  }
  0x12   :  { %636 = vsyncadd [#allocation7], 4294959072 }
  0x13   :  { %637 = dma.done.wait [#allocation10], 4096  }
  0x14   :  { %638 = vsyncadd [#allocation10], 4294963200  ;;  %v133_v0 = vld [vmem:[#allocation6 + $0xf0] sm:$0xff]  ;;  %v134_v1 = vld [vmem:[#allocation6 + $0xf8] sm:$0xff]  ;;  %vm426_vm0 = vcmask 1041409   ;;  %s650_s15 = smov [#allocation11]  }
  0x15   :  { %v131_v2 = vld [vmem:[#allocation6 + $0xe0] sm:$0xff]  ;;  %173 = vmatpush.msra.mxu0 %v133_v0  ;;  %255 = vmatpush.msra.mxu2 %v134_v1  ;;  %v165_v3 = vld [vmem:[#allocation6 + $0x1f0] sm:$0xff]  ;;  %v132_v4 = vld [vmem:[#allocation6 + $0xe8] sm:$0xff]  ;;  %s488_s16 = sshll.u32 %s650_s15, 4  ;;  %s490_s19 = sshll.u32 %s742_s5, 4  ;;  %s489_s16 = int_to_ptr.vmem [resolvable:$true] %s488_s16  ;;  %s491_s19 = int_to_ptr.hbm [resolvable:$true] %s490_s19 }
  0x16   :  { %v166_v5 = vld [vmem:[#allocation6 + $0x1f8] sm:$0xff]  ;;  %214 = vmatpush.msra.mxu1 %v165_v3  ;;  %v129_v6 = vld [vmem:[#allocation6 + $0xd0] sm:$0xff]  ;;  %v163_v7 = vld [vmem:[#allocation6 + $0x1e0] sm:$0xff] }
  0x17   :  { %296 = vmatpush.msra.mxu3 %v166_v5  ;;  %v130_v8 = vld [vmem:[#allocation6 + $0xd8] sm:$0xff]  ;;  %174 = vmatpush.msra.mxu0 %v131_v2  ;;  %v164_v9 = vld [vmem:[#allocation6 + $0x1e8] sm:$0xff]  ;;  %v161_v10 = vld [vmem:[#allocation6 + $0x1d0] sm:$0xff] }
  0x18   :  { %256 = vmatpush.msra.mxu2 %v132_v4  ;;  %215 = vmatpush.msra.mxu1 %v163_v7  ;;  %v127_v11 = vld [vmem:[#allocation6 + $0xc0] sm:$0xff]  ;;  %v128_v12 = vld [vmem:[#allocation6 + $0xc8] sm:$0xff]  ;;  %v162_v13 = vld [vmem:[#allocation6 + $0x1d8] sm:$0xff] }
  0x19   :  { %297 = vmatpush.msra.mxu3 %v164_v9  ;;  %175 = vmatpush.msra.mxu0 %v129_v6  ;;  %v159_v14 = vld [vmem:[#allocation6 + $0x1c0] sm:$0xff]  ;;  %v160_v15 = vld [vmem:[#allocation6 + $0x1c8] sm:$0xff]  ;;  %v125_v16 = vld [vmem:[#allocation6 + $0xb0] sm:$0xff] }
  0x1a   :  { %257 = vmatpush.msra.mxu2 %v130_v8  ;;  %216 = vmatpush.msra.mxu1 %v161_v10  ;;  %v126_v17 = vld [vmem:[#allocation6 + $0xb8] sm:$0xff]  ;;  %v157_v18 = vld [vmem:[#allocation6 + $0x1b0] sm:$0xff]  ;;  %v123_v20 = vld [vmem:[#allocation6 + $0xa0] sm:$0xff] }
  0x1b   :  { %298 = vmatpush.msra.mxu3 %v162_v13  ;;  %176 = vmatpush.msra.mxu0 %v127_v11  ;;  %v158_v19 = vld [vmem:[#allocation6 + $0x1b8] sm:$0xff]  ;;  %v124_v21 = vld [vmem:[#allocation6 + $0xa8] sm:$0xff]  ;;  %v155_v22 = vld [vmem:[#allocation6 + $0x1a0] sm:$0xff] }
  0x1c   :  { %258 = vmatpush.msra.mxu2 %v128_v12  ;;  %217 = vmatpush.msra.mxu1 %v159_v14  ;;  %v156_v23 = vld [vmem:[#allocation6 + $0x1a8] sm:$0xff]  ;;  %v121_v24 = vld [vmem:[#allocation6 + $0x90] sm:$0xff]  ;;  %v122_v25 = vld [vmem:[#allocation6 + $0x98] sm:$0xff] }
  0x1d   :  { %299 = vmatpush.msra.mxu3 %v160_v15  ;;  %177 = vmatpush.msra.mxu0 %v125_v16  ;;  %v153_v26 = vld [vmem:[#allocation6 + $0x190] sm:$0xff]  ;;  %v154_v27 = vld [vmem:[#allocation6 + $0x198] sm:$0xff]  ;;  %v119_v28 = vld [vmem:[#allocation6 + $0x80] sm:$0xff] }
  0x1e   :  { %259 = vmatpush.msra.mxu2 %v126_v17  ;;  %218 = vmatpush.msra.mxu1 %v157_v18  ;;  %v120_v29 = vld [vmem:[#allocation6 + $0x88] sm:$0xff]  ;;  %v151_v30 = vld [vmem:[#allocation6 + $0x180] sm:$0xff]  ;;  %v117_v32 = vld [vmem:[#allocation6 + $0x70] sm:$0xff] }
  0x1f   :  { %300 = vmatpush.msra.mxu3 %v158_v19  ;;  %178 = vmatpush.msra.mxu0 %v123_v20  ;;  %v152_v31 = vld [vmem:[#allocation6 + $0x188] sm:$0xff]  ;;  %v118_v33 = vld [vmem:[#allocation6 + $0x78] sm:$0xff]  ;;  %v149_v34 = vld [vmem:[#allocation6 + $0x170] sm:$0xff] }
  0x20   :  { %260 = vmatpush.msra.mxu2 %v124_v21  ;;  %219 = vmatpush.msra.mxu1 %v155_v22  ;;  %v150_v35 = vld [vmem:[#allocation6 + $0x178] sm:$0xff]  ;;  %v115_v36 = vld [vmem:[#allocation6 + $0x60] sm:$0xff]  ;;  %v116_v37 = vld [vmem:[#allocation6 + $0x68] sm:$0xff] }
  0x21   :  { %301 = vmatpush.msra.mxu3 %v156_v23  ;;  %179 = vmatpush.msra.mxu0 %v121_v24  ;;  %v147_v38 = vld [vmem:[#allocation6 + $0x160] sm:$0xff]  ;;  %v148_v39 = vld [vmem:[#allocation6 + $0x168] sm:$0xff]  ;;  %v113_v40 = vld [vmem:[#allocation6 + $0x50] sm:$0xff] }
  0x22   :  { %261 = vmatpush.msra.mxu2 %v122_v25  ;;  %220 = vmatpush.msra.mxu1 %v153_v26  ;;  %v114_v41 = vld [vmem:[#allocation6 + $0x58] sm:$0xff]  ;;  %v145_v42 = vld [vmem:[#allocation6 + $0x150] sm:$0xff]  ;;  %v111_v44 = vld [vmem:[#allocation6 + $0x40] sm:$0xff] }
  0x23   :  { %302 = vmatpush.msra.mxu3 %v154_v27  ;;  %180 = vmatpush.msra.mxu0 %v119_v28  ;;  %v146_v43 = vld [vmem:[#allocation6 + $0x158] sm:$0xff]  ;;  %v112_v45 = vld [vmem:[#allocation6 + $0x48] sm:$0xff]  ;;  %v143_v46 = vld [vmem:[#allocation6 + $0x140] sm:$0xff] }
  0x24   :  { %262 = vmatpush.msra.mxu2 %v120_v29  ;;  %221 = vmatpush.msra.mxu1 %v151_v30  ;;  %v144_v47 = vld [vmem:[#allocation6 + $0x148] sm:$0xff]  ;;  %v109_v48 = vld [vmem:[#allocation6 + $0x30] sm:$0xff]  ;;  %v110_v49 = vld [vmem:[#allocation6 + $0x38] sm:$0xff] }
  0x25   :  { %303 = vmatpush.msra.mxu3 %v152_v31  ;;  %181 = vmatpush.msra.mxu0 %v117_v32  ;;  %v141_v50 = vld [vmem:[#allocation6 + $0x130] sm:$0xff]  ;;  %v142_v51 = vld [vmem:[#allocation6 + $0x138] sm:$0xff]  ;;  %v107_v52 = vld [vmem:[#allocation6 + $0x20] sm:$0xff] }
  0x26   :  { %263 = vmatpush.msra.mxu2 %v118_v33  ;;  %222 = vmatpush.msra.mxu1 %v149_v34  ;;  %v108_v53 = vld [vmem:[#allocation6 + $0x28] sm:$0xff]  ;;  %v139_v54 = vld [vmem:[#allocation6 + $0x120] sm:$0xff]  ;;  %v105_v56 = vld [vmem:[#allocation6 + $0x10] sm:$0xff] }
  0x27   :  { %304 = vmatpush.msra.mxu3 %v150_v35  ;;  %182 = vmatpush.msra.mxu0 %v115_v36  ;;  %v140_v55 = vld [vmem:[#allocation6 + $0x128] sm:$0xff]  ;;  %v106_v57 = vld [vmem:[#allocation6 + $0x18] sm:$0xff]  ;;  %v137_v58 = vld [vmem:[#allocation6 + $0x110] sm:$0xff] }
  0x28   :  { %264 = vmatpush.msra.mxu2 %v116_v37  ;;  %223 = vmatpush.msra.mxu1 %v147_v38  ;;  %v138_v59 = vld [vmem:[#allocation6 + $0x118] sm:$0xff]  ;;  %v103_v60 = vld [vmem:[#allocation6] sm:$0xff]  ;;  %v104_v61 = vld [vmem:[#allocation6 + $0x8] sm:$0xff] }
  0x29   :  { %305 = vmatpush.msra.mxu3 %v148_v39  ;;  %183 = vmatpush.msra.mxu0 %v113_v40  ;;  %v87_v62 = vld [vmem:[#allocation3] sm:$0xff]  ;;  %v136_v0 = vld [vmem:[#allocation6 + $0x108] sm:$0xff]  ;;  %v89_v2 = vld [vmem:[#allocation3 + $0x10] sm:$0xff] }
  0x2a   :  { %265 = vmatpush.msra.mxu2 %v114_v41  ;;  %224 = vmatpush.msra.mxu1 %v145_v42  ;;  %v135_v63 = vld [vmem:[#allocation6 + $0x100] sm:$0xff]  ;;  %v88_v1 = vld [vmem:[#allocation3 + $0x8] sm:$0xff]  ;;  %v90_v3 = vld [vmem:[#allocation3 + $0x18] sm:$0xff] }
  0x2b   :  { %306 = vmatpush.msra.mxu3 %v146_v43  ;;  %184 = vmatpush.msra.mxu0 %v111_v44  ;;  %v91_v4 = vld [vmem:[#allocation3 + $0x20] sm:$0xff]  ;;  %v92_v5 = vld [vmem:[#allocation3 + $0x28] sm:$0xff]  ;;  %v93_v6 = vld [vmem:[#allocation3 + $0x30] sm:$0xff] }
  0x2c   :  { %266 = vmatpush.msra.mxu2 %v112_v45  ;;  %225 = vmatpush.msra.mxu1 %v143_v46  ;;  %v94_v7 = vld [vmem:[#allocation3 + $0x38] sm:$0xff]  ;;  %v95_v8 = vld [vmem:[#allocation3 + $0x40] sm:$0xff]  ;;  %v96_v9 = vld [vmem:[#allocation3 + $0x48] sm:$0xff] }
  0x2d   :  { %307 = vmatpush.msra.mxu3 %v144_v47  ;;  %185 = vmatpush.msra.mxu0 %v109_v48  ;;  %v97_v10 = vld [vmem:[#allocation3 + $0x50] sm:$0xff]  ;;  %v98_v11 = vld [vmem:[#allocation3 + $0x58] sm:$0xff]  ;;  %v99_v12 = vld [vmem:[#allocation3 + $0x60] sm:$0xff] }
  0x2e   :  { %267 = vmatpush.msra.mxu2 %v110_v49  ;;  %226 = vmatpush.msra.mxu1 %v141_v50  ;;  %v100_v13 = vld [vmem:[#allocation3 + $0x68] sm:$0xff]  ;;  %v101_v14 = vld [vmem:[#allocation3 + $0x70] sm:$0xff]  ;;  %v102_v15 = vld [vmem:[#allocation3 + $0x78] sm:$0xff] }
  0x2f   :  { %308 = vmatpush.msra.mxu3 %v142_v51  ;;  %186 = vmatpush.msra.mxu0 %v107_v52  ;;  %v405_v16 = vld [vmem:[#allocation9 + $0x78] sm:$0xff]  ;;  %v404_v18 = vld [vmem:[#allocation9 + $0x70] sm:$0xff]  ;;  %v403_v23 = vld [vmem:[#allocation9 + $0x68] sm:$0xff] }
  0x30   :  { %268 = vmatpush.msra.mxu2 %v108_v53  ;;  %227 = vmatpush.msra.mxu1 %v139_v54  ;;  %v421_v17 = vld [vmem:[#allocation9 + $0xf8] sm:$0xff]  ;;  %v420_v19 = vld [vmem:[#allocation9 + $0xf0] sm:$0xff]  ;;  %v419_v24 = vld [vmem:[#allocation9 + $0xe8] sm:$0xff] }
  0x31   :  { %309 = vmatpush.msra.mxu3 %v140_v55  ;;  %187 = vmatpush.msra.mxu0 %v105_v56  ;;  %v402_v28 = vld [vmem:[#allocation9 + $0x60] sm:$0xff]  ;;  %v401_v30 = vld [vmem:[#allocation9 + $0x58] sm:$0xff]  ;;  %v400_v33 = vld [vmem:[#allocation9 + $0x50] sm:$0xff] }
  0x32   :  { %269 = vmatpush.msra.mxu2 %v106_v57  ;;  %228 = vmatpush.msra.mxu1 %v137_v58  ;;  %v418_v29 = vld [vmem:[#allocation9 + $0xe0] sm:$0xff]  ;;  %v417_v32 = vld [vmem:[#allocation9 + $0xd8] sm:$0xff]  ;;  %v416_v34 = vld [vmem:[#allocation9 + $0xd0] sm:$0xff] }
  0x33   :  { %310 = vmatpush.msra.mxu3 %v138_v59  ;;  %188 = vmatpush.msra.mxu0 %v103_v60  ;;  %v399_v37 = vld [vmem:[#allocation9 + $0x48] sm:$0xff]  ;;  %v398_v40 = vld [vmem:[#allocation9 + $0x40] sm:$0xff]  ;;  %v397_v43 = vld [vmem:[#allocation9 + $0x38] sm:$0xff] }
  0x34   :  { %270 = vmatpush.msra.mxu2 %v104_v61  ;;  %189 = vmatmul.f32.vlgmr.msra.gmra.mxu0 %v87_v62  ;;  %v415_v38 = vld [vmem:[#allocation9 + $0xc8] sm:$0xff]  ;;  %v414_v41 = vld [vmem:[#allocation9 + $0xc0] sm:$0xff]  ;;  %v413_v44 = vld [vmem:[#allocation9 + $0xb8] sm:$0xff] }
  0x35   :  { %271 = vmatmul.f32.vlgmr.msra.gmra.mxu2 %v87_v62  ;;  %229 = vmatpush.msra.mxu1 %v135_v63  ;;  %v167_v48 = vld [vmem:[#allocation8] sm:$0x3]  ;;  %v396_v49 = vld [vmem:[#allocation9 + $0x30] sm:$0xff]  ;;  %v395_v57 = vld [vmem:[#allocation9 + $0x28] sm:$0xff] }
  0x36   :  { %311 = vmatpush.msra.mxu3 %v136_v0  ;;  %230 = vmatmul.f32.vlgmr.msra.gmra.mxu1 %v88_v1  ;;  %v412_v50 = vld [vmem:[#allocation9 + $0xb0] sm:$0xff]  ;;  %v701_v52 = vperm.slane %v167_v48, 0  ;;  %v394_v60 = vld [vmem:[#allocation9 + $0x20] sm:$0xff]  ;;  %v708_v61 = vperm.slane %v167_v48, 1 }
  0x37   :  { %312 = vmatmul.f32.vlgmr.msra.gmra.mxu3 %v88_v1  ;;  %431 = vmatpush.msrb.mxu0 %v405_v16  ;;  %v393_v1 = vld [vmem:[#allocation9 + $0x18] sm:$0xff] }
  0x38   :  { %451 = vmatpush.msrb.mxu1 %v421_v17 }
  0x39   :  { %432 = vmatpush.msrb.mxu0 %v404_v18 }
  0x3a   :  { %452 = vmatpush.msrb.mxu1 %v420_v19 }
  0x3b   :  { %433 = vmatpush.msrb.mxu0 %v403_v23  ;;  %v408_v23 = vld [vmem:[#allocation9 + $0x90] sm:$0xff] }
  0x3c   :  { %192 = vmatmul.f32.gmra.mxu0 %v89_v2  ;;  %453 = vmatpush.msrb.mxu1 %v419_v24 }
  0x3d   :  { %274 = vmatmul.f32.gmra.mxu2 %v89_v2  ;;  %434 = vmatpush.msrb.mxu0 %v402_v28  ;;  %v411_v2 = vld [vmem:[#allocation9 + $0xa8] sm:$0xff] }
  0x3e   :  { %233 = vmatmul.f32.gmra.mxu1 %v90_v3 }
  0x3f   :  { %315 = vmatmul.f32.gmra.mxu3 %v90_v3  ;;  %454 = vmatpush.msrb.mxu1 %v418_v29  ;;  %v407_v29 = vld [vmem:[#allocation9 + $0x88] sm:$0xff] }
  0x40   :  { %435 = vmatpush.msrb.mxu0 %v401_v30 }
  0x41   :  { %455 = vmatpush.msrb.mxu1 %v417_v32 }
  0x42   :  { %436 = vmatpush.msrb.mxu0 %v400_v33 }
  0x43   :  { %456 = vmatpush.msrb.mxu1 %v416_v34 }
  0x44   :  { %195 = vmatmul.f32.gmra.mxu0 %v91_v4 }
  0x45   :  { %277 = vmatmul.f32.gmra.mxu2 %v91_v4  ;;  %437 = vmatpush.msrb.mxu0 %v399_v37 }
  0x46   :  { %236 = vmatmul.f32.gmra.mxu1 %v92_v5 }
  0x47   :  { %318 = vmatmul.f32.gmra.mxu3 %v92_v5  ;;  %457 = vmatpush.msrb.mxu1 %v415_v38 }
  0x48   :  { %438 = vmatpush.msrb.mxu0 %v398_v40 }
  0x49   :  { %458 = vmatpush.msrb.mxu1 %v414_v41 }
  0x4a   :  { %439 = vmatpush.msrb.mxu0 %v397_v43 }
  0x4b   :  { %459 = vmatpush.msrb.mxu1 %v413_v44 }
  0x4c   :  { %198 = vmatmul.f32.gmra.mxu0 %v93_v6 }
  0x4d   :  { %280 = vmatmul.f32.gmra.mxu2 %v93_v6  ;;  %440 = vmatpush.msrb.mxu0 %v396_v49 }
  0x4e   :  { %239 = vmatmul.f32.gmra.mxu1 %v94_v7 }
  0x4f   :  { %321 = vmatmul.f32.gmra.mxu3 %v94_v7  ;;  %460 = vmatpush.msrb.mxu1 %v412_v50 }
  0x50   :  { %441 = vmatpush.msrb.mxu0 %v395_v57 }
  0x51   :  { %461 = vmatpush.msrb.mxu1 %v411_v2 }
  0x52   :  { %442 = vmatpush.msrb.mxu0 %v394_v60 }
  0x54   :  { %201 = vmatmul.f32.gmra.mxu0 %v95_v8 }
  0x55   :  { %283 = vmatmul.f32.gmra.mxu2 %v95_v8  ;;  %443 = vmatpush.msrb.mxu0 %v393_v1  ;;  %v392_v8 = vld [vmem:[#allocation9 + $0x10] sm:$0xff] }
  0x56   :  { %242 = vmatmul.f32.gmra.mxu1 %v96_v9 }
  0x57   :  { %324 = vmatmul.f32.gmra.mxu3 %v96_v9  ;;  %444 = vmatpush.msrb.mxu0 %v392_v8 }
  0x5c   :  { %204 = vmatmul.f32.gmra.mxu0 %v97_v10 }
  0x5d   :  { %286 = vmatmul.f32.gmra.mxu2 %v97_v10 }
  0x5e   :  { %245 = vmatmul.f32.gmra.mxu1 %v98_v11 }
  0x5f   :  { %327 = vmatmul.f32.gmra.mxu3 %v98_v11 }
  0x64   :  { %207 = vmatmul.f32.gmra.mxu0 %v99_v12 }
  0x65   :  { %289 = vmatmul.f32.gmra.mxu2 %v99_v12 }
  0x66   :  { %248 = vmatmul.f32.gmra.mxu1 %v100_v13 }
  0x67   :  { %330 = vmatmul.f32.gmra.mxu3 %v100_v13 }
  0x6c   :  { %210 = vmatmul.f32.gmra.mxu0 %v101_v14 }
  0x6d   :  { %292 = vmatmul.f32.gmra.mxu2 %v101_v14  ;;  %v410_v14 = vld [vmem:[#allocation9 + $0xa0] sm:$0xff] }
  0x6e   :  { %251 = vmatmul.f32.gmra.mxu1 %v102_v15 }
  0x6f   :  { %333 = vmatmul.f32.gmra.mxu3 %v102_v15  ;;  %v391_v15 = vld [vmem:[#allocation9 + $0x8] sm:$0xff]  ;;  %462 = vmatpush.msrb.mxu1 %v410_v14 }
  0x70   :  { %445 = vmatpush.msrb.mxu0 %v391_v15 }
  0xb1   :  { %v190_v20 = vpop.f32.mrf.mxu0 }
  0xb2   :  { %v191_v58 = vadd.f32 %v190_v20, %v701_v52  ;;  %v409_v20 = vld [vmem:[#allocation9 + $0x98] sm:$0xff] }
  0xb3   :  { %v693_v21 = vpop.f32.mrf.mxu1  ;;  %463 = vmatpush.msrb.mxu1 %v409_v20 }
  0xb4   :  { %v232_v3 = vadd.f32 %v693_v21, %v191_v58  ;;  %v390_v21 = vld [vmem:[#allocation9] sm:$0xff] }
  0xb5   :  { %446 = vmatpush.msrb.mxu0 %v390_v21  ;;  %464 = vmatpush.msrb.mxu1 %v408_v23 }
  0xb6   :  { %v337_v16 = vmax.f32 %v232_v3, 0.0 }
  0xb7   :  { %465 = vmatpush.msrb.mxu1 %v407_v29 }
  0xb8   :  { %v695_v22 = vpop.f32.mrf.mxu2 }
  0xb9   :  { %v193_v25 = vpop.f32.mrf.mxu0  ;;  %v273_v9 = vadd.f32 %v695_v22, %v708_v61 }
  0xba   :  { %v697_v26 = vpop.f32.mrf.mxu3  ;;  %v194_v55 = vadd.f32 %v193_v25, %v701_v52 }
  0xbb   :  { %v234_v27 = vpop.f32.mrf.mxu1  ;;  %v314_v22 = vadd.f32 %v697_v26, %v273_v9 }
  0xbc   :  { %v235_v62 = vadd.f32 %v234_v27, %v194_v55 }
  0xbd   :  { %v338_v26 = vmax.f32 %v314_v22, 0.0 }
  0xbe   :  { %v339_v10 = vmax.f32 %v235_v62, 0.0 }
  0xc0   :  { %v275_v31 = vpop.f32.mrf.mxu2  ;;  %v353_v24 = vadd.f32 %v339_v10, %v337_v16 }
  0xc1   :  { %v196_v35 = vpop.f32.mrf.mxu0  ;;  %v276_v4 = vadd.f32 %v275_v31, %v708_v61 }
  0xc2   :  { %v699_v36 = vpop.f32.mrf.mxu3  ;;  %v197_v59 = vadd.f32 %v196_v35, %v701_v52 }
  0xc3   :  { %v237_v39 = vpop.f32.mrf.mxu1  ;;  %v317_v17 = vadd.f32 %v699_v36, %v276_v4  ;;  %v406_v36 = vld [vmem:[#allocation9 + $0x80] sm:$0xff] }
  0xc4   :  { %v238_v5 = vadd.f32 %v237_v39, %v197_v59  ;;  %466 = vmatpush.msrb.mxu1 %v406_v36 }
  0xc5   :  { %v340_v31 = vmax.f32 %v317_v17, 0.0 }
  0xc6   :  { %v341_v18 = vmax.f32 %v238_v5, 0.0 }
  0xc7   :  { %v362_v43 = vadd.f32 %v340_v31, %v338_v26 }
  0xc8   :  { %v278_v42 = vpop.f32.mrf.mxu2  ;;  %v354_v32 = vadd.f32 %v353_v24, %v341_v18 }
  0xc9   :  { %v199_v45 = vpop.f32.mrf.mxu0  ;;  %v279_v11 = vadd.f32 %v278_v42, %v708_v61 }
  0xca   :  { %v319_v46 = vpop.f32.mrf.mxu3  ;;  %v200_v63 = vadd.f32 %v199_v45, %v701_v52 }
  0xcb   :  { %v240_v47 = vpop.f32.mrf.mxu1  ;;  %v320_v25 = vadd.f32 %v319_v46, %v279_v11 }
  0xcc   :  { %v241_v12 = vadd.f32 %v240_v47, %v200_v63 }
  0xcd   :  { %v342_v39 = vmax.f32 %v320_v25, 0.0 }
  0xce   :  { %v343_v27 = vmax.f32 %v241_v12, 0.0 }
  0xcf   :  { %v363_v48 = vadd.f32 %v362_v43, %v342_v39 }
  0xd0   :  { %v281_v51 = vpop.f32.mrf.mxu2  ;;  %v355_v40 = vadd.f32 %v354_v32, %v343_v27 }
  0xd1   :  { %v202_v53 = vpop.f32.mrf.mxu0  ;;  %v282_v19 = vadd.f32 %v281_v51, %v708_v61 }
  0xd2   :  { %v322_v54 = vpop.f32.mrf.mxu3  ;;  %v203_v37 = vadd.f32 %v202_v53, %v701_v52  ;;  %v356_v49 = vrot.slane %v355_v40, 4 }
  0xd3   :  { %v704_v56 = vpop.f32.mrf.mxu1  ;;  %v323_v33 = vadd.f32 %v322_v54, %v282_v19 }
  0xd4   :  { %v244_v45 = vadd.f32 %v704_v56, %v203_v37  ;;  %v357_v56 = vadd.f32 %v356_v49, %v355_v40 }
  0xd5   :  { %v344_v44 = vmax.f32 %v323_v33, 0.0 }
  0xd6   :  { %v345_v59 = vmax.f32 %v244_v45, 0.0  ;;  %v358_v10 = vrot.slane %v357_v56, 2 }
  0xd7   :  { %v364_v55 = vadd.f32 %v363_v48, %v344_v44 }
  0xd8   :  { %v284_v0 = vpop.f32.mrf.mxu2 }
  0xd9   :  { %v205_v6 = vpop.f32.mrf.mxu0  ;;  %v285_v51 = vadd.f32 %v284_v0, %v708_v61 }
  0xda   :  { %v713_v7 = vpop.f32.mrf.mxu3  ;;  %v206_v30 = vadd.f32 %v205_v6, %v701_v52  ;;  %v365_v6 = vrot.slane %v364_v55, 4 }
  0xdb   :  { %v246_v13 = vpop.f32.mrf.mxu1  ;;  %v326_v2 = vadd.f32 %v713_v7, %v285_v51  ;;  %v359_v7 = vadd.f32 %v358_v10, %v357_v56 }
  0xdc   :  { %v247_v42 = vadd.f32 %v246_v13, %v206_v30 }
  0xdd   :  { %v346_v12 = vmax.f32 %v326_v2, 0.0  ;;  %v360_v29 = vrot.slane %v359_v7, 1 }
  0xde   :  { %v347_v53 = vmax.f32 %v247_v42, 0.0 }
  0xdf   :  { %v361_v33 = vadd.f32 %v360_v29, %v359_v7 }
  0xe0   :  { %v287_v28 = vpop.f32.mrf.mxu2  ;;  %v371_v3 = vadd.f32 %v347_v53, %v345_v59 }
  0xe1   :  { %v208_v34 = vpop.f32.mrf.mxu0  ;;  %v288_v46 = vadd.f32 %v287_v28, %v708_v61 }
  0xe2   :  { %v328_v35 = vpop.f32.mrf.mxu3  ;;  %v209_v38 = vadd.f32 %v208_v34, %v701_v52 }
  0xe3   :  { %v249_v41 = vpop.f32.mrf.mxu1  ;;  %v329_v60 = vadd.f32 %v328_v35, %v288_v46 }
  0xe4   :  { %v250_v47 = vadd.f32 %v249_v41, %v209_v38  ;;  %v649_v41 = vmov 0.0  }
  0xe5   :  { %v348_v0 = vmax.f32 %v329_v60, 0.0  ;;  %86 = vst [vmem:[#allocation2] sm:$0x3] %v649_v41 }
  0xe6   :  { %v349_v62 = vmax.f32 %v250_v47, 0.0  ;;  %v512_v47 = vld [vmem:[%s741_s4] ss:$0 sm:$0xff] }
  0xe7   :  { %v380_v17 = vadd.f32 %v348_v0, %v346_v12 }
  0xe8   :  { %v290_v50 = vpop.f32.mrf.mxu2  ;;  %v372_v8 = vadd.f32 %v371_v3, %v349_v62 }
  0xe9   :  { %v291_v54 = vadd.f32 %v290_v50, %v708_v61  ;;  %v211_v57 = vpop.f32.mrf.mxu0 }
  0xea   :  { %v331_v58 = vpop.f32.mrf.mxu3  ;;  %v212_v63 = vadd.f32 %v211_v57, %v701_v52  ;;  %v366_v52 = vadd.f32 %v365_v6, %v364_v55 }
  0xeb   :  { %v252_v1 = vpop.f32.mrf.mxu1  ;;  %v332_v4 = vadd.f32 %v331_v58, %v291_v54 }
  0xec   :  { %v253_v5 = vadd.f32 %v252_v1, %v212_v63  ;;  %v367_v22 = vrot.slane %v366_v52, 2  ;;  %v389_v43 = vld [vmem:[#allocation2] sm:$0x3] }
  0xed   :  { %v350_v13 = vmax.f32 %v332_v4, 0.0 }
  0xee   :  { %v351_v9 = vmax.f32 %v253_v5, 0.0  ;;  %v368_v30 = vadd.f32 %v367_v22, %v366_v52 }
  0xef   :  { %v381_v20 = vadd.f32 %v380_v17, %v350_v13 }
  0xf0   :  { %v293_v11 = vpop.f32.mrf.mxu2  ;;  %v373_v14 = vadd.f32 %v372_v8, %v351_v9  ;;  %v369_v37 = vrot.slane %v368_v30, 1 }
  0xf1   :  { %v294_v15 = vadd.f32 %v293_v11, %v708_v61 }
  0xf2   :  { %v334_v16 = vpop.f32.mrf.mxu3  ;;  %v374_v18 = vrot.slane %v373_v14, 4  ;;  %v370_v26 = vadd.f32 %v369_v37, %v368_v30 }
  0xf3   :  { %v335_v19 = vadd.f32 %v334_v16, %v294_v15 }
  0xf4   :  { %v375_v21 = vadd.f32 %v374_v18, %v373_v14 }
  0xf5   :  { %v352_v23 = vmax.f32 %v335_v19, 0.0 }
  0xf6   :  { %v376_v24 = vrot.slane %v375_v21, 2 }
  0xf7   :  { %v382_v25 = vadd.f32 %v381_v20, %v352_v23 }
  0xf8   :  { %v377_v27 = vadd.f32 %v376_v24, %v375_v21 }
  0xf9   :  { %v383_v28 = vrot.slane %v382_v25, 4 }
  0xfa   :  { %v378_v32 = vrot.slane %v377_v27, 1 }
  0xfb   :  { %v384_v31 = vadd.f32 %v383_v28, %v382_v25 }
  0xfc   :  { %v379_v34 = vadd.f32 %v378_v32, %v377_v27 }
  0xfd   :  { %v385_v61 = vrot.slane %v384_v31, 2 }
  0xfe   :  { %v427_v36 = vsel %vm426_vm0, %v379_v34, %v361_v33 }
  0xff   :  { %v386_v35 = vadd.f32 %v385_v61, %v384_v31  ;;  %447 = vmatmul.f32.vlgmr.msrb.gmra.mxu0 %v427_v36 }
 0x101   :  { %v387_v38 = vrot.slane %v386_v35, 1 }
 0x103   :  { %v388_v39 = vadd.f32 %v387_v38, %v386_v35 }
 0x105   :  { %v428_v40 = vsel %vm426_vm0, %v388_v39, %v370_v26 }
 0x106   :  { %467 = vmatmul.f32.vlgmr.msrb.gmra.mxu1 %v428_v40 }
 0x17c   :  { %v448_v42 = vpop.f32.mrf.mxu0 }
 0x183   :  { %v468_v44 = vpop.f32.mrf.mxu1 }
 0x184   :  { %v469_v45 = vadd.f32 %v468_v44, %v448_v42 }
 0x186   :  { %v471_v46 = vadd.f32 %v469_v45, %v389_v43 }
 0x188   :  { %472 = vst [vmem:[#allocation2] sm:$0x3] %v471_v46 }
 0x18f   :  { %v476_v48 = vld [vmem:[#allocation2] sm:$0x3] }
 0x190   :  { %v481_v49 = vadd.f32 %v512_v47, %v476_v48 }
 0x192   :  { %482 = vst [vmem:[#allocation11] sm:$0x3] %v481_v49 }
 0x193   :  { %493 = dma.vmem_to_hbm [thread:$0]  %s489_s16, 32, %s491_s19, [#allocation5]  }
 0x194   :  { %639 = dma.done.wait [#allocation5], 32  }
 0x195   :  { %640 = vsyncadd [#allocation5], 4294967264 }
 0x196   :  { %498 = vsyncpa [#allocation4], 1 }
 0x197   :  { %499 = vsyncpa [#allocation7], 1 }
 0x198   :  { %500 = vsyncpa [#allocation10], 1 }
 0x199   :  { %501 = vsyncpa [#allocation5], 1 }

</bundles_post_ra>
